<compile_context>
chip_gen: v5e
topology: v5e:2x2
jax: 0.10.0
libtpu: 0.0.40
codegen_flags: <defaults>
</compile_context>

<pallas_src>
import math
from functools import partial

import jax
import jax.numpy as jnp
from jax.experimental import pallas as pl
from jax.experimental.pallas import tpu as pltpu


# ----------------------------------------------------------------------------
# Helpers
# ----------------------------------------------------------------------------
def _full_spec(shape):
    """BlockSpec covering the full array (single grid step)."""
    return pl.BlockSpec(shape, lambda i: (0,) * len(shape))


# ----------------------------------------------------------------------------
# Kernel 1: initial trans layer for both streams (single launch)
# ----------------------------------------------------------------------------
def _init_trans_kernel(xc_ref, qc_ref, tw_ref, tb_ref, xo_ref, qo_ref):
    # Linear(1, D) is just a broadcast multiply-add.
    xo_ref[...] = xc_ref[...] * tw_ref[...] + tb_ref[...]
    qo_ref[...] = qc_ref[...] * tw_ref[...] + tb_ref[...]


def init_trans(x_col, q_col, tw, tb):
    Nd, Nq = x_col.shape[0], q_col.shape[0]
    D = tw.shape[1]
    return pl.pallas_call(
        _init_trans_kernel,
        out_shape=(jax.ShapeDtypeStruct((Nd, D), jnp.float32),
                   jax.ShapeDtypeStruct((Nq, D), jnp.float32)),
        grid=(1,),
        in_specs=[_full_spec((Nd, 1)), _full_spec((Nq, 1)),
                  _full_spec((1, D)), _full_spec((1, D))],
        out_specs=(_full_spec((Nd, D)), _full_spec((Nq, D))),
    )(x_col, q_col, tw, tb.reshape(1, D))


# ----------------------------------------------------------------------------
# Kernel 2: one fused Multi_GINs layer step
#   trans(new rows) -> append -> GCN (linear + adj@x) -> arrg MLP (stacked)
#   -> CrossGraphFormer (masked full-width heads, softmax over query axis)
# ----------------------------------------------------------------------------
def _layer_kernel(xprev_ref, qprev_ref, xnew_ref, qnew_ref, adj_ref, qadj_ref,
                  tw_ref, tb_ref, gw_ref, gb_ref, qw_ref, qb_ref,
                  aw1_ref, ab1_ref, aw2_ref, ab2_ref,
                  wq_ref, wk_ref, wv_ref,
                  xo_ref, qo_ref, *, num_heads, d_k):
    f32 = jnp.float32
    D = tw_ref.shape[1]
    Md = xo_ref.shape[0]

    # 1) trans layer (Linear(1, D)) on the newly streamed node values.
    x_new = xnew_ref[...] * tw_ref[...] + tb_ref[...]
    q_new = qnew_ref[...] * tw_ref[...] + tb_ref[...]

    # 2) torch.cat((x, x_in), dim=0) — done in VMEM, no HBM round-trip.
    x = jnp.concatenate([xprev_ref[...], x_new], axis=0)        # (Nd, D)
    qx = jnp.concatenate([qprev_ref[...], q_new], axis=0)       # (Nq, D)

    # 3) G/Q GCN layers (stream-specific weights): adj @ (x @ W + b).
    x = jnp.dot(adj_ref[...],
                jnp.dot(x, gw_ref[...], preferred_element_type=f32) + gb_ref[...],
                preferred_element_type=f32)                     # (Md, D)
    qx = jnp.dot(qadj_ref[...],
                 jnp.dot(qx, qw_ref[...], preferred_element_type=f32) + qb_ref[...],
                 preferred_element_type=f32)                    # (Mq, D)

    # 4) arrg MLP — shared weights, so stack both streams into one matmul.
    s = jnp.concatenate([x, qx], axis=0)                        # (Md+Mq, D)
    h = jnp.dot(s, aw1_ref[...], preferred_element_type=f32) + ab1_ref[...]
    h = jnp.where(h > 0, h, 0.01 * h)                           # LeakyReLU(0.01)
    s = jnp.dot(h, aw2_ref[...], preferred_element_type=f32) + ab2_ref[...]
    x, qx = s[:Md], s[Md:]

    # 5) CrossGraphFormer: scores_h = K_h Q_h^T / sqrt(d_k) (K from data graph,
    #    Q and V from the query graph), softmax over the query axis,
    #    out = P_h V_h, residual added to x.  Heads are computed with
    #    full-lane-width masked matmuls (no d_k-wide lane slicing, no concat).
    q = jnp.dot(qx, wq_ref[...], preferred_element_type=f32)    # (Mq, D)
    k = jnp.dot(x, wk_ref[...], preferred_element_type=f32)     # (Md, D)
    v = jnp.dot(qx, wv_ref[...], preferred_element_type=f32)    # (Mq, D)
    scale = 1.0 / math.sqrt(d_k)
    lane = jax.lax.broadcasted_iota(jnp.int32, (1, D), 1)
    acc = jnp.zeros((Md, D), f32)
    for hh in range(num_heads):
        mask = jnp.logical_and(lane >= hh * d_k,
                               lane < (hh + 1) * d_k).astype(f32)   # (1, D)
        sc = jnp.dot(k * mask, q.T, preferred_element_type=f32) * scale  # (Md, Mq)
        sc = sc - jnp.max(sc, axis=-1, keepdims=True)
        p = jnp.exp(sc)
        p = p * pl.reciprocal(jnp.sum(p, axis=-1, keepdims=True), approx=True)
        # TODO(synk): nn.Dropout(0.1) on attention weights is identity in eval mode.
        acc = acc + jnp.dot(p, v * mask, preferred_element_type=f32)
    xo_ref[...] = acc + x
    qo_ref[...] = qx


def fused_layer(x_prev, q_prev, x_vec, q_vec, adj, q_adj, p, num_heads=4):
    D = p["trans_w"].shape[1]
    d_k = D // num_heads
    Md, Nd = adj.shape
    Mq, Nq = q_adj.shape
    x_new = x_vec.reshape(-1, 1).astype(jnp.float32)
    q_new = q_vec.reshape(-1, 1).astype(jnp.float32)
    assert x_prev.shape[0] + x_new.shape[0] == Nd
    assert q_prev.shape[0] + q_new.shape[0] == Nq

    args = (x_prev, q_prev, x_new, q_new, adj, q_adj,
            p["trans_w"], p["trans_b"].reshape(1, D),
            p["g_w"], p["g_b"].reshape(1, D),
            p["q_w"], p["q_b"].reshape(1, D),
            p["arrg_w1"], p["arrg_b1"].reshape(1, 2 * D),
            p["arrg_w2"], p["arrg_b2"].reshape(1, D),
            p["attn_wq"], p["attn_wk"], p["attn_wv"])

    return pl.pallas_call(
        partial(_layer_kernel, num_heads=num_heads, d_k=d_k),
        out_shape=(jax.ShapeDtypeStruct((Md, D), jnp.float32),
                   jax.ShapeDtypeStruct((Mq, D), jnp.float32)),
        grid=(1,),
        in_specs=[_full_spec(a.shape) for a in args],
        out_specs=(_full_spec((Md, D)), _full_spec((Mq, D))),
        compiler_params=pltpu.CompilerParams(dimension_semantics=("arbitrary",)),
    )(*args)


# ----------------------------------------------------------------------------
# Kernel 3: Regression head (sum-pool both graphs + 3-layer ReLU MLP)
# ----------------------------------------------------------------------------
def _regression_kernel(qx_ref, gx_ref, w1_ref, b1_ref, w2_ref, b2_ref,
                       w3_ref, b3_ref, o_ref):
    qf = jnp.sum(qx_ref[...], axis=0, keepdims=True)            # (1, D)
    gf = jnp.sum(gx_ref[...], axis=0, keepdims=True)            # (1, D)
    feat = jnp.concatenate([qf, gf], axis=-1)                   # (1, 2D)
    h = jnp.dot(feat, w1_ref[...], preferred_element_type=jnp.float32) + b1_ref[...]
    h = jnp.maximum(h, 0.0)
    h = jnp.dot(h, w2_ref[...], preferred_element_type=jnp.float32) + b2_ref[...]
    h = jnp.maximum(h, 0.0)
    h = jnp.dot(h, w3_ref[...], preferred_element_type=jnp.float32) + b3_ref[...]
    o_ref[...] = jnp.maximum(h, 0.0)                            # (1, 1)


def regression(q_x, g_x, params):
    Nq, D = q_x.shape
    Ng = g_x.shape[0]
    w1, b1, w2, b2, w3, b3 = params
    out = pl.pallas_call(
        _regression_kernel,
        out_shape=jax.ShapeDtypeStruct((1, 1), jnp.float32),
        grid=(1,),
        in_specs=[_full_spec((Nq, D)), _full_spec((Ng, D)),
                  _full_spec(w1.shape), _full_spec((1, w1.shape[1])),
                  _full_spec(w2.shape), _full_spec((1, w2.shape[1])),
                  _full_spec(w3.shape), _full_spec((1, w3.shape[1]))],
        out_specs=_full_spec((1, 1)),
    )(q_x, g_x, w1, b1.reshape(1, -1), w2, b2.reshape(1, -1),
      w3, b3.reshape(1, -1))
    return out[0, 0]


# ----------------------------------------------------------------------------
# Model glue (pure Python loop over the graph streams; one kernel per layer)
# ----------------------------------------------------------------------------
def init_params(key, out_dim):
    """Deterministic init (kaiming-uniform style bounds), weights stored (in, out)."""
    D = out_dim
    names_shapes = [
        ("trans_w", (1, D)), ("trans_b", (D,)),
        ("g_w", (D, D)), ("g_b", (D,)),
        ("q_w", (D, D)), ("q_b", (D,)),
        ("arrg_w1", (D, 2 * D)), ("arrg_b1", (2 * D,)),
        ("arrg_w2", (2 * D, D)), ("arrg_b2", (D,)),
        ("attn_wq", (D, D)), ("attn_wk", (D, D)), ("attn_wv", (D, D)),
        ("reg_w1", (2 * D, D)), ("reg_b1", (D,)),
        ("reg_w2", (D, D // 2)), ("reg_b2", (D // 2,)),
        ("reg_w3", (D // 2, 1)), ("reg_b3", (1,)),
    ]
    params = {}
    keys = jax.random.split(key, len(names_shapes))
    for (name, shape), k in zip(names_shapes, keys):
        fan_in = shape[0] if len(shape) == 2 else max(shape[0], 1)
        bound = 1.0 / math.sqrt(max(fan_in, 1))
        params[name] = jax.random.uniform(k, shape, jnp.float32, -bound, bound)
    return params


def multi_gins_forward(query_items, data_items, p, num_heads=4):
    data_it = iter(data_items)
    query_it = iter(query_items)
    _, x_vec = next(data_it)
    _, qx_vec = next(query_it)
    x, q_x = init_trans(x_vec.reshape(-1, 1), qx_vec.reshape(-1, 1),
                        p["trans_w"], p["trans_b"])
    while True:
        try:
            adj, x_vec = next(data_it)
            q_adj, qx_vec = next(query_it)
        except StopIteration:
            break
        x, q_x = fused_layer(x, q_x, x_vec, qx_vec, adj, q_adj, p, num_heads)
    return x, q_x


def flow_learner_forward(query_items, data_items, p):
    g_x, q_x = multi_gins_forward(query_items, data_items, p)
    pred = regression(q_x, g_x,
                      (p["reg_w1"], p["reg_b1"], p["reg_w2"], p["reg_b2"],
                       p["reg_w3"], p["reg_b3"]))
    return pred


# ----------------------------------------------------------------------------
# Demo
# ----------------------------------------------------------------------------
if __name__ == "__main__":
    OUT_DIM = 32
    key = jax.random.PRNGKey(0)
    kp, kd = jax.random.split(key)
    params = init_params(kp, OUT_DIM)

    ks = jax.random.split(kd, 12)

    # data-graph stream: (adj_or_None, node_value_vector)
    data_items = [
        (None,                                              jax.random.normal(ks[0], (8,), jnp.float32)),
        (jax.random.uniform(ks[1], (16, 16), jnp.float32),  jax.random.normal(ks[2], (8,), jnp.float32)),
        (jax.random.uniform(ks[3], (16, 24), jnp.float32),  jax.random.normal(ks[4], (8,), jnp.float32)),
    ]
    # query-graph stream
    query_items = [
        (None,                                              jax.random.normal(ks[5], (8,), jnp.float32)),
        (jax.random.uniform(ks[6], (8, 16), jnp.float32),   jax.random.normal(ks[7], (8,), jnp.float32)),
        (jax.random.uniform(ks[8], (8, 16), jnp.float32),   jax.random.normal(ks[9], (8,), jnp.float32)),
    ]

    pred = flow_learner_forward(query_items, data_items, params)
    pred = jax.block_until_ready(pred)
    assert pred.shape == () and jnp.isfinite(pred)
    print("KERNEL_OK")
</pallas_src>

<mosaic_0001>
module attributes {stable_mosaic.version = 11 : i64} {
  func.func @_init_trans_kernel(%arg0: i32, %arg1: memref<8x1xf32, #tpu.memory_space<vmem>>, %arg2: memref<8x1xf32, #tpu.memory_space<vmem>>, %arg3: memref<1x32xf32, #tpu.memory_space<vmem>>, %arg4: memref<1x32xf32, #tpu.memory_space<vmem>>, %arg5: memref<8x32xf32, #tpu.memory_space<vmem>>, %arg6: memref<8x32xf32, #tpu.memory_space<vmem>>) attributes {dimension_semantics = [#tpu.dimension_semantics<arbitrary>], iteration_bounds = array<i64: 1>, scalar_prefetch = 0 : i64, scratch_operands = 0 : i64, tpu.core_type = #tpu.core_type<tc>, window_params = [{pipeline_mode = #tpu.pipeline_mode<synchronous>, transform_indices = @transform_0, window_bounds = array<i64: 8, 1>}, {pipeline_mode = #tpu.pipeline_mode<synchronous>, transform_indices = @transform_1, window_bounds = array<i64: 8, 1>}, {pipeline_mode = #tpu.pipeline_mode<synchronous>, transform_indices = @transform_2, window_bounds = array<i64: 1, 32>}, {pipeline_mode = #tpu.pipeline_mode<synchronous>, transform_indices = @transform_3, window_bounds = array<i64: 1, 32>}, {pipeline_mode = #tpu.pipeline_mode<synchronous>, transform_indices = @transform_4, window_bounds = array<i64: 8, 32>}, {pipeline_mode = #tpu.pipeline_mode<synchronous>, transform_indices = @transform_5, window_bounds = array<i64: 8, 32>}]} {
    %c0 = arith.constant 0 : index
    %c0_0 = arith.constant 0 : index
    %0 = vector.load %arg1[%c0, %c0_0] : memref<8x1xf32, #tpu.memory_space<vmem>>, vector<8x1xf32>
    %c0_1 = arith.constant 0 : index
    %c0_2 = arith.constant 0 : index
    %1 = vector.load %arg3[%c0_1, %c0_2] : memref<1x32xf32, #tpu.memory_space<vmem>>, vector<1x32xf32>
    %2 = vector.broadcast %0 : vector<8x1xf32> to vector<8x32xf32>
    %3 = vector.broadcast %1 : vector<1x32xf32> to vector<8x32xf32>
    %4 = arith.mulf %2, %3 : vector<8x32xf32>
    %c0_3 = arith.constant 0 : index
    %c0_4 = arith.constant 0 : index
    %5 = vector.load %arg4[%c0_3, %c0_4] : memref<1x32xf32, #tpu.memory_space<vmem>>, vector<1x32xf32>
    %6 = vector.broadcast %5 : vector<1x32xf32> to vector<8x32xf32>
    %7 = arith.addf %4, %6 : vector<8x32xf32>
    %c0_5 = arith.constant 0 : index
    %c0_6 = arith.constant 0 : index
    %8 = vector.load %arg5[%c0_5, %c0_6] : memref<8x32xf32, #tpu.memory_space<vmem>>, vector<8x32xf32>
    tpu.vector_store %arg5[%c0_5, %c0_6], %7 {strides = array<i32>} : memref<8x32xf32, #tpu.memory_space<vmem>>, vector<8x32xf32>,
    %c0_7 = arith.constant 0 : index
    %c0_8 = arith.constant 0 : index
    %9 = vector.load %arg2[%c0_7, %c0_8] : memref<8x1xf32, #tpu.memory_space<vmem>>, vector<8x1xf32>
    %c0_9 = arith.constant 0 : index
    %c0_10 = arith.constant 0 : index
    %10 = vector.load %arg3[%c0_9, %c0_10] : memref<1x32xf32, #tpu.memory_space<vmem>>, vector<1x32xf32>
    %11 = vector.broadcast %9 : vector<8x1xf32> to vector<8x32xf32>
    %12 = vector.broadcast %10 : vector<1x32xf32> to vector<8x32xf32>
    %13 = arith.mulf %11, %12 : vector<8x32xf32>
    %c0_11 = arith.constant 0 : index
    %c0_12 = arith.constant 0 : index
    %14 = vector.load %arg4[%c0_11, %c0_12] : memref<1x32xf32, #tpu.memory_space<vmem>>, vector<1x32xf32>
    %15 = vector.broadcast %14 : vector<1x32xf32> to vector<8x32xf32>
    %16 = arith.addf %13, %15 : vector<8x32xf32>
    %c0_13 = arith.constant 0 : index
    %c0_14 = arith.constant 0 : index
    %17 = vector.load %arg6[%c0_13, %c0_14] : memref<8x32xf32, #tpu.memory_space<vmem>>, vector<8x32xf32>
    tpu.vector_store %arg6[%c0_13, %c0_14], %16 {strides = array<i32>} : memref<8x32xf32, #tpu.memory_space<vmem>>, vector<8x32xf32>,
    return
  }
  func.func @transform_0(%arg0: i32) -> (i32, i32) {
    %c0_i32 = arith.constant 0 : i32
    %c0_i32_0 = arith.constant 0 : i32
    %c0_i32_1 = arith.constant 0 : i32
    return %c0_i32, %c0_i32_0 : i32, i32
  }
  func.func @transform_1(%arg0: i32) -> (i32, i32) {
    %c0_i32 = arith.constant 0 : i32
    %c0_i32_0 = arith.constant 0 : i32
    %c0_i32_1 = arith.constant 0 : i32
    return %c0_i32, %c0_i32_0 : i32, i32
  }
  func.func @transform_2(%arg0: i32) -> (i32, i32) {
    %c0_i32 = arith.constant 0 : i32
    %c0_i32_0 = arith.constant 0 : i32
    %c0_i32_1 = arith.constant 0 : i32
    return %c0_i32, %c0_i32_0 : i32, i32
  }
  func.func @transform_3(%arg0: i32) -> (i32, i32) {
    %c0_i32 = arith.constant 0 : i32
    %c0_i32_0 = arith.constant 0 : i32
    %c0_i32_1 = arith.constant 0 : i32
    return %c0_i32, %c0_i32_0 : i32, i32
  }
  func.func @transform_4(%arg0: i32) -> (i32, i32) {
    %c0_i32 = arith.constant 0 : i32
    %c0_i32_0 = arith.constant 0 : i32
    %c0_i32_1 = arith.constant 0 : i32
    return %c0_i32, %c0_i32_0 : i32, i32
  }
  func.func @transform_5(%arg0: i32) -> (i32, i32) {
    %c0_i32 = arith.constant 0 : i32
    %c0_i32_0 = arith.constant 0 : i32
    %c0_i32_1 = arith.constant 0 : i32
    return %c0_i32, %c0_i32_0 : i32, i32
  }
}

</mosaic_0001>

<bundles_post_ra>
// kernel: tpu_custom_call.1
= control target key start
LH: loop header
LB: loop body
LE: loop exit
PB: predicated region body
PF: predicated region fallthrough
CT: control target
= control target key end

     0   :  { %11 = vsyncpa [#allocation3], 0  ;;  %v148_v1 = vmov 0   ;;  %s207_s0 = inlined_call_operand.vmem [shape: f32[8,1], index: 0, kind: input, shape index: {}]   ;;  %s208_s1 = inlined_call_operand.vmem [shape: f32[8,1], index: 1, kind: input, shape index: {}]   ;;  %s209_s2 = inlined_call_operand.vmem [shape: f32[1,32], index: 2, kind: input, shape index: {}]   ;;  %s210_s3 = inlined_call_operand.vmem [shape: f32[1,32], index: 3, kind: input, shape index: {}]   ;;  %s211_s4 = inlined_call_operand.hbm [shape: f32[8,32], index: 4, kind: output, shape index: {0}]   ;;  %s212_s5 = inlined_call_operand.hbm [shape: f32[8,32], index: 5, kind: output, shape index: {1}]  }
   0x1   :  { %v21_v0 = vld [vmem:[%s207_s0] sm:$0xff]  ;;  %91 = vset.pattern.permute.xlu0 %v148_v1 }
   0x2   :  { %25 = vperm.xlu0 %91, %v21_v0  }
   0x3   :  { %12 = vsyncpa [#allocation5], 0  ;;  %v39_v2 = vld [vmem:[%s208_s1] sm:$0xff]  ;;  %s149_s26 = smov [#allocation2]   ;;  %s63_s29 = sshll.u32 %s211_s4, 4  ;;  %vm37_vm0 = vcmask 261120   ;;  %s64_s29 = int_to_ptr.hbm [resolvable:$true] %s63_s29 }
   0x4   :  { %v92_v3 = vld [vmem:[%s209_s2] ss:$0 sm:$0xff]  ;;  %s61_s0 = sshll.u32 %s149_s26, 4  ;;  %s150_s8 = smov [#allocation4]   ;;  %s62_s0 = int_to_ptr.vmem [resolvable:$true] %s61_s0 }
   0x5   :  { %v93_v4 = vld [vmem:[%s210_s3] ss:$0 sm:$0xff]  ;;  %s72_s9 = sshll.u32 %s150_s8, 4  ;;  %s74_s11 = sshll.u32 %s212_s5, 4  ;;  %s73_s9 = int_to_ptr.vmem [resolvable:$true] %s72_s9  ;;  %s75_s11 = int_to_ptr.hbm [resolvable:$true] %s74_s11 }
   0x6   :  { %v94_v8 = vld [vmem:[%s209_s2] ss:$0 sm:$0xff] }
   0x7   :  { %v95_v9 = vld [vmem:[%s210_s3] ss:$0 sm:$0xff] }
   0xa   :  { %43 = vperm.xlu0 %91, %v39_v2  }
  0x74   :  { %v26_v5 = vpop.permute.xlu0 %25 }
  0x75   :  { %v31_v6 = vmul.f32 %v92_v3, %v26_v5 }
  0x77   :  { %v36_v7 = vadd.f32 %v93_v4, %v31_v6 }
  0x79   :  { %38 = vst.msk [vmem:[#allocation2] sm:$0xff] %vm37_vm0, %v36_v7 }
  0x7a   :  { %66 = dma.vmem_to_hbm [thread:$0]  %s62_s0, 128, %s64_s29, [#allocation3]  }
  0x7c   :  { %v44_v10 = vpop.permute.xlu0 %43 }
  0x7d   :  { %v49_v11 = vmul.f32 %v94_v8, %v44_v10 }
  0x7f   :  { %v54_v12 = vadd.f32 %v95_v9, %v49_v11 }
  0x81   :  { %55 = vst.msk [vmem:[#allocation4] sm:$0xff] %vm37_vm0, %v54_v12 }
  0x82   :  { %77 = dma.vmem_to_hbm [thread:$0]  %s73_s9, 128, %s75_s11, [#allocation5]  }
  0x83   :  { %144 = dma.done.wait [#allocation3], 128  }
  0x84   :  { %145 = vsyncadd [#allocation3], 4294967168 }
  0x85   :  { %146 = dma.done.wait [#allocation5], 128  }
  0x86   :  { %147 = vsyncadd [#allocation5], 4294967168 }
  0x87   :  { %86 = vsyncpa [#allocation3], 1 }
  0x88   :  { %87 = vsyncpa [#allocation5], 1 }

</bundles_post_ra>
